<compile_context>
chip_gen: v7x
topology: tpu7x:2x2x1
jax: 0.10.0
libtpu: 0.0.40
codegen_flags: <defaults>
</compile_context>

<pallas_src>
import jax
import jax.numpy as jnp
from jax.experimental import pallas as pl
from jax.experimental.pallas import tpu as pltpu


def decoder_kernel(x_ref, w1_ref, b1_ref, w2_ref, b2_ref, o_ref):
    # x_ref : [TB, LP]   (latent input tile, lane-dense, zero-padded features)
    # w1_ref: [LP, LP]   (linear1 weight, in x out, resident)
    # b1_ref: [1,  LP]   (linear1 bias row, resident)
    # w2_ref: [LP, TP]   (linear2 weight, in x out, resident)
    # b2_ref: [1,  TP]   (linear2 bias row, resident)
    # o_ref : [TB, TP]
    x = x_ref[...]
    h = jnp.dot(x, w1_ref[...], preferred_element_type=jnp.float32)
    h = jnp.tanh(h + b1_ref[...])
    out = jnp.dot(h.astype(w2_ref.dtype), w2_ref[...],
                  preferred_element_type=jnp.float32) + b2_ref[...]
    o_ref[...] = out.astype(o_ref.dtype)


def _round_up(n, m):
    return m * pl.cdiv(n, m)


def decoder_forward(x, w1, b1, w2, b2, *, block_b=256):
    """Fused Decoder forward.

    x : [B, L]         latent input
    w1: [L, L]         linear1 weight, already transposed to (in, out)
    b1: [L]            linear1 bias
    w2: [L, T]         linear2 weight, already transposed to (in, out)
    b2: [T]            linear2 bias
    """
    B, L = x.shape
    T = w2.shape[1]

    # --- one-time host-side padding: lane-dense matmuls / stores -------------
    LP = _round_up(L, 128)          # padded latent (contraction + hidden lanes)
    TP = _round_up(T, 128)          # padded output lanes (unmasked vst)

    x_p = jnp.pad(x, ((0, 0), (0, LP - L)))
    w1_p = jnp.pad(w1, ((0, LP - L), (0, LP - L)))
    b1_p = jnp.pad(b1.reshape(1, L), ((0, 0), (0, LP - L)))
    w2_p = jnp.pad(w2, ((0, LP - L), (0, TP - T)))
    b2_p = jnp.pad(b2.reshape(1, T), ((0, 0), (0, TP - T)))

    # --- batch tiling ---------------------------------------------------------
    # TB: multiple of 8 sublanes, capped at block_b; pad B up to a multiple.
    tb = min(block_b, B)
    tb = max(8, (tb // 8) * 8)
    BP = _round_up(B, tb)
    if BP != B:
        x_p = jnp.pad(x_p, ((0, BP - B), (0, 0)))
    grid = (BP // tb,)

    # VMEM budget (f32, double-buffered activations + resident weights) is tiny
    # at these sizes (< 1 MiB for TB=256, LP=TP=128); well under v7x's 64 MiB.
    out_p = pl.pallas_call(
        decoder_kernel,
        out_shape=jax.ShapeDtypeStruct((BP, TP), x.dtype),
        grid=grid,
        in_specs=[
            pl.BlockSpec((tb, LP), lambda i: (i, 0)),   # x: streamed per batch tile
            pl.BlockSpec((LP, LP), lambda i: (0, 0)),   # w1: resident
            pl.BlockSpec((1, LP), lambda i: (0, 0)),    # b1: resident
            pl.BlockSpec((LP, TP), lambda i: (0, 0)),   # w2: resident
            pl.BlockSpec((1, TP), lambda i: (0, 0)),    # b2: resident
        ],
        out_specs=pl.BlockSpec((tb, TP), lambda i: (i, 0)),
        compiler_params=pltpu.CompilerParams(
            dimension_semantics=("parallel",),          # v7x: shard batch across TCs
        ),
    )(x_p, w1_p, b1_p, w2_p, b2_p)

    return out_p[:B, :T]


def xavier_normal(key, fan_out, fan_in, dtype=jnp.float32):
    # Matches torch.nn.init.xavier_normal_ for a [fan_out, fan_in] weight.
    std = (2.0 / (fan_in + fan_out)) ** 0.5
    return std * jax.random.normal(key, (fan_out, fan_in), dtype=dtype)


if __name__ == "__main__":
    # hyper_params: latent_size=32, total_items=128
    latent_size = 32
    total_items = 128

    key = jax.random.PRNGKey(0)
    k_x, k_w1, k_b1, k_w2, k_b2, k_x2 = jax.random.split(key, 6)

    # PyTorch Linear stores weight as [out, in]; xavier_normal_ applied to it.
    w1_torch = xavier_normal(k_w1, latent_size, latent_size)   # [L, L]
    w2_torch = xavier_normal(k_w2, total_items, latent_size)   # [T, L]
    # Biases follow nn.Linear default init: U(-1/sqrt(fan_in), 1/sqrt(fan_in)).
    bound = 1.0 / (latent_size ** 0.5)
    b1 = jax.random.uniform(k_b1, (latent_size,), minval=-bound, maxval=bound)
    b2 = jax.random.uniform(k_b2, (total_items,), minval=-bound, maxval=bound)

    # Pre-transpose weights to [in, out] for lane-dense MXU matmuls.
    w1 = w1_torch.T  # [L, L]
    w2 = w2_torch.T  # [L, T]

    def reference(xv):
        return jnp.tanh(xv @ w1_torch.T + b1) @ w2_torch.T + b2

    # Case 1: batch large enough to exercise the batch-tiled grid (grid=(4,)).
    batch = 512
    x = jax.random.normal(k_x, (batch, latent_size), dtype=jnp.float32)
    out = decoder_forward(x, w1, b1, w2, b2, block_b=128)
    out = jax.block_until_ready(out)
    assert out.shape == (batch, total_items)
    assert jnp.allclose(out, reference(x), atol=1e-5, rtol=1e-5), "mismatch (tiled)"

    # Case 2: ragged batch (not a multiple of 8) to exercise the padding path.
    batch2 = 13
    x2 = jax.random.normal(k_x2, (batch2, latent_size), dtype=jnp.float32)
    out2 = decoder_forward(x2, w1, b1, w2, b2)
    out2 = jax.block_until_ready(out2)
    assert out2.shape == (batch2, total_items)
    assert jnp.allclose(out2, reference(x2), atol=1e-5, rtol=1e-5), "mismatch (ragged)"

    print("KERNEL_OK")
</pallas_src>

<mosaic_0001>
module attributes {stable_mosaic.version = 11 : i64} {
  func.func @decoder_kernel(%arg0: i32, %arg1: memref<128x128xf32, #tpu.memory_space<vmem>>, %arg2: memref<128x128xf32, #tpu.memory_space<vmem>>, %arg3: memref<1x128xf32, #tpu.memory_space<vmem>>, %arg4: memref<128x128xf32, #tpu.memory_space<vmem>>, %arg5: memref<1x128xf32, #tpu.memory_space<vmem>>, %arg6: memref<128x128xf32, #tpu.memory_space<vmem>>) attributes {dimension_semantics = [#tpu.dimension_semantics<parallel>], iteration_bounds = array<i64: 4>, scalar_prefetch = 0 : i64, scratch_operands = 0 : i64, tpu.core_type = #tpu.core_type<tc>, window_params = [{transform_indices = @transform_0, window_bounds = array<i64: 128, 128>}, {pipeline_mode = #tpu.pipeline_mode<synchronous>, transform_indices = @transform_1, window_bounds = array<i64: 128, 128>}, {pipeline_mode = #tpu.pipeline_mode<synchronous>, transform_indices = @transform_2, window_bounds = array<i64: 1, 128>}, {pipeline_mode = #tpu.pipeline_mode<synchronous>, transform_indices = @transform_3, window_bounds = array<i64: 128, 128>}, {pipeline_mode = #tpu.pipeline_mode<synchronous>, transform_indices = @transform_4, window_bounds = array<i64: 1, 128>}, {transform_indices = @transform_5, window_bounds = array<i64: 128, 128>}]} {
    %c0 = arith.constant 0 : index
    %c0_0 = arith.constant 0 : index
    %0 = vector.load %arg1[%c0, %c0_0] : memref<128x128xf32, #tpu.memory_space<vmem>>, vector<128x128xf32>
    %c0_1 = arith.constant 0 : index
    %c0_2 = arith.constant 0 : index
    %1 = vector.load %arg2[%c0_1, %c0_2] : memref<128x128xf32, #tpu.memory_space<vmem>>, vector<128x128xf32>
    %cst = arith.constant dense<0.000000e+00> : vector<128x128xf32>
    %2 = tpu.matmul %0, %1, %cst {dimension_numbers = #tpu.dot_dimension_numbers<[1], [0], [0], [1], [0, 0, 1, 1], [], []>} : vector<128x128xf32>, vector<128x128xf32>, vector<128x128xf32> -> vector<128x128xf32>
    %c0_3 = arith.constant 0 : index
    %c0_4 = arith.constant 0 : index
    %3 = vector.load %arg3[%c0_3, %c0_4] : memref<1x128xf32, #tpu.memory_space<vmem>>, vector<1x128xf32>
    %4 = vector.broadcast %3 : vector<1x128xf32> to vector<128x128xf32>
    %5 = arith.addf %2, %4 : vector<128x128xf32>
    %6 = math.tanh %5 : vector<128x128xf32>
    %c0_5 = arith.constant 0 : index
    %c0_6 = arith.constant 0 : index
    %7 = vector.load %arg4[%c0_5, %c0_6] : memref<128x128xf32, #tpu.memory_space<vmem>>, vector<128x128xf32>
    %cst_7 = arith.constant dense<0.000000e+00> : vector<128x128xf32>
    %8 = tpu.matmul %6, %7, %cst_7 {dimension_numbers = #tpu.dot_dimension_numbers<[1], [0], [0], [1], [0, 0, 1, 1], [], []>} : vector<128x128xf32>, vector<128x128xf32>, vector<128x128xf32> -> vector<128x128xf32>
    %c0_8 = arith.constant 0 : index
    %c0_9 = arith.constant 0 : index
    %9 = vector.load %arg5[%c0_8, %c0_9] : memref<1x128xf32, #tpu.memory_space<vmem>>, vector<1x128xf32>
    %10 = vector.broadcast %9 : vector<1x128xf32> to vector<128x128xf32>
    %11 = arith.addf %8, %10 : vector<128x128xf32>
    %c0_10 = arith.constant 0 : index
    %c0_11 = arith.constant 0 : index
    %12 = vector.load %arg6[%c0_10, %c0_11] : memref<128x128xf32, #tpu.memory_space<vmem>>, vector<128x128xf32>
    tpu.vector_store %arg6[%c0_10, %c0_11], %11 {strides = array<i32>} : memref<128x128xf32, #tpu.memory_space<vmem>>, vector<128x128xf32>,
    return
  }
  func.func @transform_0(%arg0: i32) -> (i32, i32) {
    %c0_i32 = arith.constant 0 : i32
    %c0_i32_0 = arith.constant 0 : i32
    return %arg0, %c0_i32 : i32, i32
  }
  func.func @transform_1(%arg0: i32) -> (i32, i32) {
    %c0_i32 = arith.constant 0 : i32
    %c0_i32_0 = arith.constant 0 : i32
    %c0_i32_1 = arith.constant 0 : i32
    return %c0_i32, %c0_i32_0 : i32, i32
  }
  func.func @transform_2(%arg0: i32) -> (i32, i32) {
    %c0_i32 = arith.constant 0 : i32
    %c0_i32_0 = arith.constant 0 : i32
    %c0_i32_1 = arith.constant 0 : i32
    return %c0_i32, %c0_i32_0 : i32, i32
  }
  func.func @transform_3(%arg0: i32) -> (i32, i32) {
    %c0_i32 = arith.constant 0 : i32
    %c0_i32_0 = arith.constant 0 : i32
    %c0_i32_1 = arith.constant 0 : i32
    return %c0_i32, %c0_i32_0 : i32, i32
  }
  func.func @transform_4(%arg0: i32) -> (i32, i32) {
    %c0_i32 = arith.constant 0 : i32
    %c0_i32_0 = arith.constant 0 : i32
    %c0_i32_1 = arith.constant 0 : i32
    return %c0_i32, %c0_i32_0 : i32, i32
  }
  func.func @transform_5(%arg0: i32) -> (i32, i32) {
    %c0_i32 = arith.constant 0 : i32
    %c0_i32_0 = arith.constant 0 : i32
    return %arg0, %c0_i32 : i32, i32
  }
}

</mosaic_0001>

<bundles_post_ra>
// kernel: tpu_custom_call.1
= control target key start
LH: loop header
LB: loop body
LE: loop exit
PB: predicated region body
PF: predicated region fallthrough
CT: control target
= control target key end

     0   :  { %10 = vsyncpa [#allocation3], 0  ;;  %s1624_s0 = inlined_call_operand.hbm [shape: f32[512,128], index: 0, kind: input, shape index: {}]   ;;  %s1625_s1 = inlined_call_operand.hbm [shape: f32[128,128], index: 1, kind: input, shape index: {}]   ;;  %s1626_s2 = inlined_call_operand.vmem [shape: f32[1,128], index: 2, kind: input, shape index: {}]   ;;  %s1627_s3 = inlined_call_operand.hbm [shape: f32[128,128], index: 3, kind: input, shape index: {}]   ;;  %s1628_s4 = inlined_call_operand.vmem [shape: f32[1,128], index: 4, kind: input, shape index: {}]   ;;  %s1629_s5 = inlined_call_operand.hbm [shape: f32[512,128], index: 5, kind: output, shape index: {}]  }
   0x1   :  { %12 = vsyncpa [#allocation3 + $0x1], 0 }
   0x2   :  { %13 = vsyncpa [#allocation6], 0 }
   0x3   :  { %14 = vsyncpa [#allocation4], 0 }
   0x4   :  { %16 = vsyncpa [#allocation4 + $0x1], 0  ;;  %s1325_s18 = smov 0   ;;  %s1327_s19 = smov 0  }
   0x5   :  { %s1329_s20 = smov 0   ;;  %s1331_s21 = smov 0  }
   0x6 LB: > { %s1346_s22 = sadd.s32 4294967295, %s1285_s21   ;;  %s764_s23 = sadd.s32 4294967294, %s1285_s21   ;;  %s1285_s21 = sphi %s1331_s21, %s1648_s21   ;;  %s1281_s20 = sphi %s1329_s20, %s1647_s20   ;;  %s1277_s19 = sphi %s1327_s19, %s1646_s19   ;;  %s1273_s18 = sphi %s1325_s18, %s1645_s18  }
   0x7   : > { %p42_p0 = scmp.ne.s32.totalorder %s1277_s19, %s1273_s18  ;;  %p1630_p1 = scmp.eq.s32.totalorder %s1346_s22, 0 }
   0x8   : > { %p156_p3 = scmp.eq.s32.totalorder %s764_s23, 3  ;;  %p765_p5 = scmp.ge.s32.totalorder %s1285_s21, 1 }
   0x9   : > { %p1355_p4 = por %p1630_p1, %p42_p0  ;;  %p163_p7 = scmp.lt.s32.totalorder %s1285_s21, 5 }
   0xa   : > { %p1360_p6 = por %p156_p3, %p42_p0  ;;  %s1287_s27 = smov [#allocation5]  }
   0xb   : > { %s1633_s24 = scalar_select %p1355_p4, 1, 0 }
   0xc   : > { %s1634_s25 = scalar_select %p1360_p6, 1, 0 }
   0xd   : > { %p1365_p8 = pnand %p765_p5, %p163_p7  ;;  %s175_s28 = sshll.u32 %s1287_s27, 4  ;;  %s176_s28 = int_to_ptr.vmem [resolvable:$true] %s175_s28 }
   0xe   : > { %s1288_s30 = smov [#allocation7]   ;;  %s1129_s9 = scalar_lea.hbm %s1625_s1, 2048 }
   0xf   : > { %s1635_s26 = scalar_select %p1365_p8, 1, 0 }
  0x10   : > { %p1038_p9 = pneg %p1365_p8  ;;  %s191_s6 = sshll.u32 %s1288_s30, 4  ;;  %s1377_s6 = int_to_ptr.vmem [resolvable:$true] %s191_s6 }
  0x11   : > { %p1130_p11 = scmp.ne.s32.totalorder %s1625_s1, %s1129_s9  ;;  %p1136_p3 = scmp.lt.u32.totalorder %s1129_s9, %s1625_s1 }
  0x12   : > { %p1373_p10 = pnand %p1038_p9, %p1630_p1 }
  0x14   : > { %p1131_p12 = pneg %p1373_p10 }
  0x16   : > { %p1132_p13 = pnand %p1131_p12, %p1130_p11 }
  0x18   : > { %p1133_p0 = pneg %p1132_p13 }
  0x1a   : > { %p1138_p5 = pnand %p1136_p3, %p1133_p0 }
  0x1c   : > { %1141 = shalt.err (!%p1138_p5)
}
  0x1d   : > { %s1142_s14 = scalar_lea.vmem %s176_s28, 2048  ;;  %p1150_p2 = scmp.lt.s32.totalorder %s176_s28, %s176_s28 }
  0x1e   : > { %p1143_p7 = scmp.ne.s32.totalorder %s176_s28, %s1142_s14  ;;  %p1151_p6 = scmp.lt.s32.totalorder %s1142_s14, %s1142_s14 }
  0x20   : > { %p1145_p9 = pnand %p1143_p7, %p1131_p12  ;;  %p1152_p4 = por %p1151_p6, %p1150_p2 }
  0x22   : > { %p1146_p1 = pneg %p1145_p9 }
  0x24   : > { %p1153_p8 = pnand %p1152_p4, %p1146_p1 }
  0x26   : > { %1156 = shalt.err (!%p1153_p8)
}
  0x27   : > { %s1289_s15 = smov 128   ;;  %s1290_s16 = smov 8  }
  0x28   : > { %1041 = dma.hbm_to_vmem [thread:$0]  (!%p1373_p10), %s1625_s1, 2048, %s176_s28, [#allocation6], %s1289_s15, %s1289_s15, %s1290_s16  }
  0x29   : > { %s1157_s7 = scalar_lea.hbm %s1627_s3, 2048 }
  0x2a   : > { %p1158_p1 = scmp.ne.s32.totalorder %s1627_s3, %s1157_s7  ;;  %p1164_p6 = scmp.lt.u32.totalorder %s1157_s7, %s1627_s3 }
  0x2c   : > { %p1160_p2 = pnand %p1158_p1, %p1131_p12 }
  0x2e   : > { %p1161_p4 = pneg %p1160_p2 }
  0x30   : > { %p1166_p8 = pnand %p1164_p6, %p1161_p4 }
  0x32   : > { %1169 = shalt.err (!%p1166_p8)
}
  0x33   : > { %s1170_s28 = scalar_lea.vmem %s1377_s6, 2048  ;;  %p1178_p3 = scmp.lt.s32.totalorder %s1377_s6, %s1377_s6 }
  0x34   : > { %p1171_p11 = scmp.ne.s32.totalorder %s1377_s6, %s1170_s28  ;;  %p1179_p5 = scmp.lt.s32.totalorder %s1170_s28, %s1170_s28 }
  0x36   : > { %p1173_p13 = pnand %p1171_p11, %p1131_p12  ;;  %p1180_p7 = por %p1179_p5, %p1178_p3 }
  0x38   : > { %p1174_p0 = pneg %p1173_p13 }
  0x3a   : > { %p1181_p9 = pnand %p1180_p7, %p1174_p0 }
  0x3c   : > { %1184 = shalt.err (!%p1181_p9)
}
  0x3d   : > { %1044 = dma.hbm_to_vmem [thread:$0]  (!%p1373_p10), %s1627_s3, 2048, %s1377_s6, [#allocation6], %s1289_s15, %s1289_s15, %s1290_s16  }
  0x3e   : > { %s1433_s29 = sadd.s32 1, %s1285_s21   ;;  %s29_s14 = sadd.s32 1, %s1281_s20 }
  0x3f   : > { %s26_s17 = ssub.s32 %s1285_s21, %s1433_s29  ;;  %p36_p12 = scmp.ne.s32.totalorder %s1281_s20, %s1277_s19 }
  0x40   : > { %p27_p1 = scmp.eq.s32.totalorder %s26_s17, 0  ;;  %p37_p2 = scmp.eq.s32.totalorder %s1285_s21, 0 }
  0x41   : > { %p1637_p4 = scmp.eq.s32.totalorder %s1346_s22, 3  ;;  %p1055_p8 = scmp.lt.s32.totalorder %s1285_s21, 4 }
  0x42   : > { %s1449_s27 = scalar_select %p27_p1, %s1281_s20, %s29_s14  }
  0x43   : > { %p1443_p6 = por %p1637_p4, %p36_p12  ;;  %p38_p11 = por %p37_p2, %p36_p12 }
  0x44   : > { %s208_s30 = sand.u32 1, %s1281_s20   ;;  %s784_s6 = sshll.u32 %s1285_s21, 11 }
  0x45   : > { %s769_s7 = sshll.u32 %s208_s30, 7  ;;  %s1456_s10 = scalar_lea.hbm %s1624_s0, %s784_s6 }
  0x46   : > { %s212_s11 = scalar_lea.vmem [#allocation2], %s769_s7  ;;  %p1460_p10 = pnand %p1055_p8, %p38_p11 }
  0x47   : > { %s219_s28 = sshll.u32 %s212_s11, 4  ;;  %s1464_s13 = scalar_lea.sflag [#allocation3], %s208_s30  ;;  %s1458_s28 = int_to_ptr.vmem [resolvable:$true] %s219_s28 }
  0x48   : > { %s1185_s14 = scalar_lea.hbm %s1456_s10, 2048  ;;  %p1187_p0 = pneg %p1460_p10 }
  0x49   : > { %p1186_p13 = scmp.ne.s32.totalorder %s1456_s10, %s1185_s14  ;;  %s1190_s6 = scalar_lea.hbm %s1624_s0, 8192 }
  0x4a   : > { %p1191_p7 = scmp.lt.u32.totalorder %s1456_s10, %s1624_s0  ;;  %p1192_p9 = scmp.lt.u32.totalorder %s1190_s6, %s1185_s14 }
  0x4b   : > { %p1188_p3 = pnand %p1187_p0, %p1186_p13  ;;  %p1194_p1 = scmp.lt.u32.totalorder %s1185_s14, %s1456_s10 }
  0x4c   : > { %p1193_p12 = por %p1192_p9, %p1191_p7 }
  0x4d   : > { %p1189_p5 = pneg %p1188_p3 }
  0x4e   : > { %p1195_p2 = por %p1194_p1, %p1193_p12 }
  0x50   : > { %p1196_p4 = pnand %p1195_p2, %p1189_p5 }
  0x52   : > { %1199 = shalt.err (!%p1196_p4)
}
  0x53   : > { %s1200_s30 = scalar_lea.vmem %s1458_s28, 2048  ;;  %s1291_s11 = smov [#allocation2]  }
  0x54   : > { %p1201_p8 = scmp.ne.s32.totalorder %s1458_s28, %s1200_s30  ;;  %s1205_s17 = sshll.u32 %s1291_s11, 4  ;;  %s1206_s17 = int_to_ptr.vmem [resolvable:$false] %s1205_s17 }
  0x55   : > { %s1207_s7 = scalar_lea.vmem %s1206_s17, 4096  ;;  %p1208_p3 = scmp.lt.s32.totalorder %s1458_s28, %s1206_s17 }
  0x56   : > { %p1203_p11 = pnand %p1201_p8, %p1187_p0  ;;  %p1209_p7 = scmp.lt.s32.totalorder %s1207_s7, %s1200_s30 }
  0x58   : > { %p1204_p13 = pneg %p1203_p11  ;;  %p1210_p9 = por %p1209_p7, %p1208_p3 }
  0x5a   : > { %p1211_p12 = pnand %p1210_p9, %p1204_p13 }
  0x5c   : > { %1214 = shalt.err (!%p1211_p12)
}
  0x5d   : > { %1048 = dma.hbm_to_vmem [thread:$0]  (!%p1460_p10), %s1456_s10, 2048, %s1458_s28, %s1464_s13, %s1289_s15, %s1289_s15, %s1290_s16  }
  0x5e   : > { %p1640_p0 = scmp.ne.s32.totalorder %s1635_s26, 0 }
  0x5f   : > { %s1498_s14 = sand.u32 (!%p1640_p0), 1, %s1277_s19   ;;  %p1641_p5 = scmp.ne.s32.totalorder (!%p1640_p0), %s1633_s24, 0 }
  0x60   : > { %231 = sbr.rel (%p1640_p0) target bundleno = 627 (0x273), region = 40  ;;  %s773_s6 = sshll.u32 (!%p1640_p0), %s1498_s14, 7 }
  0x61   : > { %s234_s8 = scalar_lea.sflag (!%p1640_p0), [#allocation3], %s1498_s14  ;;  %s1504_s12 = scalar_lea.vmem (!%p1640_p0), [#allocation2], %s773_s6 }
  0x67   : > { %1260 = dma.done.wait (%p1641_p5), %s234_s8, 2048  }
  0x68   : > { %1262 = vsyncadd (%p1641_p5), %s234_s8, 4294965248  ;;  %p1642_p10 = scmp.eq.s32.totalorder %s1346_s22, 0 }
  0x6a   : > { %1264 = dma.done.wait (%p1642_p10), [#allocation6], 4096   ;;  %p1643_p1 = pmov %p1642_p10 }
  0x6b   : > { %v290_v0 = vld [vmem:[#allocation5] sm:$0xff]  ;;  %v291_v1 = vld [vmem:[#allocation5 + $0x8] sm:$0xff]  ;;  %v292_v2 = vld [vmem:[#allocation5 + $0x10] sm:$0xff]  ;;  %s1556_s10 = scalar_lea.vmem [#allocation8], %s773_s6  ;;  %s785_s28 = sshll.u32 %s1346_s22, 11 }
  0x6c   : > { %1266 = vsyncadd (%p1643_p1), [#allocation6], 4294963200  ;;  %v962_v3 = vpack.c.bf16 %v291_v1, %v290_v0  ;;  %v293_v4 = vld [vmem:[#allocation5 + $0x18] sm:$0xff]  ;;  %v294_v6 = vld [vmem:[#allocation5 + $0x20] sm:$0xff]  ;;  %s672_s13 = sshll.u32 %s1556_s10, 4  ;;  %s1577_s11 = scalar_lea.hbm %s1629_s5, %s785_s28  ;;  %s1579_s13 = int_to_ptr.vmem [resolvable:$true] %s672_s13 }
  0x6d   : > { %v966_v5 = vpack.c.bf16 %v293_v4, %v292_v2  ;;  %v295_v7 = vld [vmem:[#allocation5 + $0x28] sm:$0xff]  ;;  %v274_v9 = vld [vmem:[%s1504_s12] sm:$0xff]  ;;  %v296_v10 = vld [vmem:[#allocation5 + $0x30] sm:$0xff]  ;;  %s659_s22 = scalar_lea.sflag [#allocation4], %s1498_s14  ;;  %s1215_s17 = scalar_lea.vmem %s1579_s13, 2048 }
  0x6e   : > { %963 = vmatprep.subr.bf16.mxu0 %v962_v3  ;;  %v970_v8 = vpack.c.bf16 %v295_v7, %v294_v6  ;;  %v297_v11 = vld [vmem:[#allocation5 + $0x38] sm:$0xff]  ;;  %882 = vmatprep.mubr.f32.mxu0 %v274_v9  ;;  %v298_v13 = vld [vmem:[#allocation5 + $0x40] sm:$0xff]  ;;  %v299_v14 = vld [vmem:[#allocation5 + $0x48] sm:$0xff]  ;;  %p1216_p2 = scmp.ne.s32.totalorder %s1579_s13, %s1215_s17  ;;  %s1292_s7 = smov [#allocation8]  }
  0x6f   : > { %965 = vmatpush3.bf16.msra.mxu0 %v962_v3  ;;  %v974_v12 = vpack.c.bf16 %v297_v11, %v296_v10  ;;  %v474_v15 = vld [vmem:[#allocation7] sm:$0xff]  ;;  %v475_v16 = vld [vmem:[#allocation7 + $0x8] sm:$0xff]  ;;  %v476_v17 = vld [vmem:[#allocation7 + $0x10] sm:$0xff]  ;;  %v978_v21 = vpack.c.bf16 %v299_v14, %v298_v13  ;;  %s1219_s6 = sshll.u32 %s1292_s7, 4  ;;  %s1220_s6 = int_to_ptr.vmem [resolvable:$false] %s1219_s6 }
  0x70   : > { %967 = vmatprep.subr.bf16.mxu0 %v966_v5  ;;  %v477_v18 = vld [vmem:[#allocation7 + $0x18] sm:$0xff]  ;;  %v994_v19 = vpack.c.bf16 %v475_v16, %v474_v15  ;;  %v478_v22 = vld [vmem:[#allocation7 + $0x20] sm:$0xff]  ;;  %v479_v23 = vld [vmem:[#allocation7 + $0x28] sm:$0xff]  ;;  %p1217_p4 = pnand %p1216_p2, %p1443_p6  ;;  %s1221_s8 = scalar_lea.vmem %s1220_s6, 4096 }
  0x71   : > { %v998_v20 = vpack.c.bf16 %v477_v18, %v476_v17  ;;  %v300_v24 = vld [vmem:[#allocation5 + $0x50] sm:$0xff]  ;;  %v301_v25 = vld [vmem:[#allocation5 + $0x58] sm:$0xff]  ;;  %v1002_v26 = vpack.c.bf16 %v479_v23, %v478_v22  ;;  %v302_v30 = vld [vmem:[#allocation5 + $0x60] sm:$0xff]  ;;  %p1222_p11 = scmp.lt.s32.totalorder %s1579_s13, %s1220_s6  ;;  %p1223_p13 = scmp.lt.s32.totalorder %s1221_s8, %s1215_s17 }
  0x72   : > { %995 = vmatprep.subr.bf16.mxu1 %v994_v19  ;;  %v982_v27 = vpack.c.bf16 %v301_v25, %v300_v24  ;;  %v480_v28 = vld [vmem:[#allocation7 + $0x30] sm:$0xff]  ;;  %v481_v29 = vld [vmem:[#allocation7 + $0x38] sm:$0xff]  ;;  %v303_v31 = vld [vmem:[#allocation5 + $0x68] sm:$0xff]  ;;  %p1218_p8 = pneg %p1217_p4 }
  0x73   : > { %969 = vmatpush3.bf16.msra.mxu0 %v966_v5  ;;  %997 = vmatpush3.bf16.msra.mxu1 %v994_v19  ;;  %v1006_v32 = vpack.c.bf16 %v481_v29, %v480_v28  ;;  %v986_v33 = vpack.c.bf16 %v303_v31, %v302_v30  ;;  %v304_v34 = vld [vmem:[#allocation5 + $0x70] sm:$0xff]  ;;  %v305_v35 = vld [vmem:[#allocation5 + $0x78] sm:$0xff]  ;;  %v275_v37 = vld [vmem:[%s1504_s12 + $0x8] sm:$0xff]  ;;  %p1224_p3 = por %p1223_p13, %p1222_p11 }
  0x74   : > { %971 = vmatprep.subr.bf16.mxu0 %v970_v8  ;;  %999 = vmatprep.subr.bf16.mxu1 %v998_v20  ;;  %v990_v36 = vpack.c.bf16 %v305_v35, %v304_v34  ;;  %v276_v38 = vld [vmem:[%s1504_s12 + $0x10] sm:$0xff]  ;;  %v277_v39 = vld [vmem:[%s1504_s12 + $0x18] sm:$0xff]  ;;  %v278_v40 = vld [vmem:[%s1504_s12 + $0x20] sm:$0xff] }
  0x75   : > { %v279_v41 = vld [vmem:[%s1504_s12 + $0x28] sm:$0xff]  ;;  %v280_v42 = vld [vmem:[%s1504_s12 + $0x30] sm:$0xff]  ;;  %v281_v43 = vld [vmem:[%s1504_s12 + $0x38] sm:$0xff]  ;;  %p1225_p7 = pnand %p1224_p3, %p1218_p8 }
  0x76   : > { %v282_v44 = vld [vmem:[%s1504_s12 + $0x40] sm:$0xff]  ;;  %v283_v45 = vld [vmem:[%s1504_s12 + $0x48] sm:$0xff]  ;;  %v284_v46 = vld [vmem:[%s1504_s12 + $0x50] sm:$0xff] }
  0x77   : > { %973 = vmatpush3.bf16.msra.mxu0 %v970_v8  ;;  %1001 = vmatpush3.bf16.msra.mxu1 %v998_v20  ;;  %v285_v47 = vld [vmem:[%s1504_s12 + $0x58] sm:$0xff]  ;;  %v286_v48 = vld [vmem:[%s1504_s12 + $0x60] sm:$0xff]  ;;  %v287_v49 = vld [vmem:[%s1504_s12 + $0x68] sm:$0xff] }
  0x78   : > { %975 = vmatprep.subr.bf16.mxu0 %v974_v12  ;;  %1003 = vmatprep.subr.bf16.mxu1 %v1002_v26  ;;  %v288_v50 = vld [vmem:[%s1504_s12 + $0x70] sm:$0xff]  ;;  %v289_v51 = vld [vmem:[%s1504_s12 + $0x78] sm:$0xff]  ;;  %v482_v52 = vld [vmem:[#allocation7 + $0x40] sm:$0xff] }
  0x79   : > { %v483_v53 = vld [vmem:[#allocation7 + $0x48] sm:$0xff]  ;;  %v484_v55 = vld [vmem:[#allocation7 + $0x50] sm:$0xff]  ;;  %v485_v56 = vld [vmem:[#allocation7 + $0x58] sm:$0xff] }
  0x7a   : > { %v1010_v54 = vpack.c.bf16 %v483_v53, %v482_v52  ;;  %v1014_v57 = vpack.c.bf16 %v485_v56, %v484_v55  ;;  %v486_v58 = vld [vmem:[#allocation7 + $0x60] sm:$0xff]  ;;  %v487_v59 = vld [vmem:[#allocation7 + $0x68] sm:$0xff]  ;;  %v488_v61 = vld [vmem:[#allocation7 + $0x70] sm:$0xff] }
  0x7b   : > { %977 = vmatpush3.bf16.msra.mxu0 %v974_v12  ;;  %1005 = vmatpush3.bf16.msra.mxu1 %v1002_v26  ;;  %v1018_v60 = vpack.c.bf16 %v487_v59, %v486_v58  ;;  %v489_v62 = vld [vmem:[#allocation7 + $0x78] sm:$0xff]  ;;  %v1533_v0 = vld [vmem:[%s1626_s2] ss:$0 sm:$0xff] }
  0x7c   : > { %979 = vmatprep.subr.bf16.mxu0 %v978_v21  ;;  %1007 = vmatprep.subr.bf16.mxu1 %v1006_v32  ;;  %v1022_v63 = vpack.c.bf16 %v489_v62, %v488_v61 }
  0x7f   : > { %981 = vmatpush3.bf16.msra.mxu0 %v978_v21  ;;  %1009 = vmatpush3.bf16.msra.mxu1 %v1006_v32 }
  0x80   : > { %983 = vmatprep.subr.bf16.mxu0 %v982_v27  ;;  %1011 = vmatprep.subr.bf16.mxu1 %v1010_v54 }
  0x83   : > { %985 = vmatpush3.bf16.msra.mxu0 %v982_v27  ;;  %1013 = vmatpush3.bf16.msra.mxu1 %v1010_v54 }
  0x84   : > { %987 = vmatprep.subr.bf16.mxu0 %v986_v33  ;;  %1015 = vmatprep.subr.bf16.mxu1 %v1014_v57 }
  0x87   : > { %989 = vmatpush3.bf16.msra.mxu0 %v986_v33  ;;  %1017 = vmatpush3.bf16.msra.mxu1 %v1014_v57 }
  0x88   : > { %991 = vmatprep.subr.bf16.mxu0 %v990_v36  ;;  %1019 = vmatprep.subr.bf16.mxu1 %v1018_v60 }
  0x8b   : > { %993 = vmatpush3.bf16.msra.mxu0 %v990_v36  ;;  %1021 = vmatpush3.bf16.msra.mxu1 %v1018_v60 }
  0x8c   : > { %1023 = vmatprep.subr.bf16.mxu1 %v1022_v63 }
  0x8e   : > { %883 = vmatmul.mubr.f32.vlgmr.msra.gmra.mrb[0].mxu0 %v275_v37 }
  0x8f   : > { %885 = vmatprep.mubr.f32.mxu0 %v276_v38  ;;  %1025 = vmatpush3.bf16.msra.mxu1 %v1022_v63 }
  0x92   : > { %886 = vmatmul.mubr.f32.gmra.mrb[2].mxu0 %v277_v39 }
  0x93   : > { %888 = vmatprep.mubr.f32.mxu0 %v278_v40 }
  0x96   : > { %889 = vmatmul.mubr.f32.gmra.mrb[4].mxu0 %v279_v41 }
  0x97   : > { %891 = vmatprep.mubr.f32.mxu0 %v280_v42 }
  0x9a   : > { %892 = vmatmul.mubr.f32.gmra.mrb[6].mxu0 %v281_v43 }
  0x9b   : > { %894 = vmatprep.mubr.f32.mxu0 %v282_v44 }
  0x9e   : > { %895 = vmatmul.mubr.f32.gmra.mrb[8].mxu0 %v283_v45 }
  0x9f   : > { %897 = vmatprep.mubr.f32.mxu0 %v284_v46 }
  0xa2   : > { %898 = vmatmul.mubr.f32.gmra.mrb[10].mxu0 %v285_v47 }
  0xa3   : > { %900 = vmatprep.mubr.f32.mxu0 %v286_v48 }
  0xa6   : > { %901 = vmatmul.mubr.f32.gmra.mrb[12].mxu0 %v287_v49  ;;  %v778_v49 = vld [vmem:[%s1628_s4] ss:$0 sm:$0xff] }
  0xa7   : > { %903 = vmatprep.mubr.f32.mxu0 %v288_v50 }
  0xaa   : > { %904 = vmatmul.mubr.f32.gmra.mrb[14].mxu0 %v289_v51 }
 0x161   : > { %v884_v1 = vpop.f32.mrb[0].mxu0 }
 0x162   : > { %v385_v2 = vadd.f32 %v884_v1, %v1533_v0  ;;  %v379_v3 = vpop.f32.mrb[1].mxu0 }
 0x163   : > { %v380_v4 = vadd.f32 %v1533_v0, %v379_v3 }
 0x165   : > { %1097 = vtanh.f32 %v380_v4  ;;  %v887_v5 = vpop.f32.mrb[2].mxu0 }
 0x166   : > { %1099 = vtanh.f32 %v385_v2  ;;  %v395_v6 = vadd.f32 %v887_v5, %v1533_v0  ;;  %v389_v7 = vpop.f32.mrb[3].mxu0 }
 0x167   : > { %v390_v8 = vadd.f32 %v1533_v0, %v389_v7 }
 0x169   : > { %1101 = vtanh.f32 %v390_v8  ;;  %v890_v9 = vpop.f32.mrb[4].mxu0 }
 0x16a   : > { %1103 = vtanh.f32 %v395_v6  ;;  %v405_v10 = vadd.f32 %v890_v9, %v1533_v0  ;;  %v399_v11 = vpop.f32.mrb[5].mxu0 }
 0x16b   : > { %v400_v12 = vadd.f32 %v1533_v0, %v399_v11 }
 0x16d   : > { %1105 = vtanh.f32 %v400_v12  ;;  %v893_v13 = vpop.f32.mrb[6].mxu0 }
 0x16e   : > { %1107 = vtanh.f32 %v405_v10  ;;  %v415_v14 = vadd.f32 %v893_v13, %v1533_v0  ;;  %v409_v15 = vpop.f32.mrb[7].mxu0 }
 0x16f   : > { %v1098_v16 = vpop.eup %1097  ;;  %v410_v17 = vadd.f32 %v1533_v0, %v409_v15 }
 0x170   : > { %v1100_v18 = vpop.eup %1099  ;;  %938 = vmatprep.mubr.f32.mxu1 %v1098_v16 }
 0x171   : > { %1109 = vtanh.f32 %v410_v17  ;;  %v896_v19 = vpop.f32.mrb[8].mxu0  ;;  %939 = vmatmul.mubr.f32.vlgmr.msra.gmra.mrb[0].mxu1 %v1100_v18 }
 0x172   : > { %1111 = vtanh.f32 %v415_v14  ;;  %v425_v20 = vadd.f32 %v896_v19, %v1533_v0  ;;  %v419_v21 = vpop.f32.mrb[9].mxu0 }
 0x173   : > { %v1102_v22 = vpop.eup %1101  ;;  %v420_v23 = vadd.f32 %v1533_v0, %v419_v21 }
 0x174   : > { %v1104_v24 = vpop.eup %1103  ;;  %941 = vmatprep.mubr.f32.mxu1 %v1102_v22 }
 0x175   : > { %1113 = vtanh.f32 %v420_v23  ;;  %v899_v25 = vpop.f32.mrb[10].mxu0  ;;  %942 = vmatmul.mubr.f32.gmra.mrb[2].mxu1 %v1104_v24 }
 0x176   : > { %1115 = vtanh.f32 %v425_v20  ;;  %v435_v26 = vadd.f32 %v899_v25, %v1533_v0  ;;  %v429_v27 = vpop.f32.mrb[11].mxu0 }
 0x177   : > { %v1106_v28 = vpop.eup %1105  ;;  %v430_v29 = vadd.f32 %v1533_v0, %v429_v27 }
 0x178   : > { %v1108_v30 = vpop.eup %1107  ;;  %944 = vmatprep.mubr.f32.mxu1 %v1106_v28 }
 0x179   : > { %1117 = vtanh.f32 %v430_v29  ;;  %v902_v31 = vpop.f32.mrb[12].mxu0  ;;  %945 = vmatmul.mubr.f32.gmra.mrb[4].mxu1 %v1108_v30 }
 0x17a   : > { %1119 = vtanh.f32 %v435_v26  ;;  %v445_v32 = vadd.f32 %v902_v31, %v1533_v0  ;;  %v439_v33 = vpop.f32.mrb[13].mxu0 }
 0x17b   : > { %v1110_v34 = vpop.eup %1109  ;;  %v440_v35 = vadd.f32 %v1533_v0, %v439_v33 }
 0x17c   : > { %v1112_v36 = vpop.eup %1111  ;;  %947 = vmatprep.mubr.f32.mxu1 %v1110_v34 }
 0x17d   : > { %1121 = vtanh.f32 %v440_v35  ;;  %v905_v37 = vpop.f32.mrb[14].mxu0  ;;  %948 = vmatmul.mubr.f32.gmra.mrb[6].mxu1 %v1112_v36 }
 0x17e   : > { %1123 = vtanh.f32 %v445_v32  ;;  %v455_v38 = vadd.f32 %v905_v37, %v1533_v0  ;;  %v449_v39 = vpop.f32.mrb[15].mxu0 }
 0x17f   : > { %v1114_v40 = vpop.eup %1113  ;;  %v450_v41 = vadd.f32 %v1533_v0, %v449_v39 }
 0x180   : > { %v1116_v42 = vpop.eup %1115  ;;  %950 = vmatprep.mubr.f32.mxu1 %v1114_v40 }
 0x181   : > { %1125 = vtanh.f32 %v450_v41  ;;  %951 = vmatmul.mubr.f32.gmra.mrb[8].mxu1 %v1116_v42 }
 0x182   : > { %1127 = vtanh.f32 %v455_v38 }
 0x183   : > { %v1118_v43 = vpop.eup %1117 }
 0x184   : > { %v1120_v44 = vpop.eup %1119  ;;  %953 = vmatprep.mubr.f32.mxu1 %v1118_v43 }
 0x185   : > { %954 = vmatmul.mubr.f32.gmra.mrb[10].mxu1 %v1120_v44 }
 0x187   : > { %v1122_v45 = vpop.eup %1121 }
 0x188   : > { %v1124_v46 = vpop.eup %1123  ;;  %956 = vmatprep.mubr.f32.mxu1 %v1122_v45 }
 0x189   : > { %957 = vmatmul.mubr.f32.gmra.mrb[12].mxu1 %v1124_v46 }
 0x18b   : > { %v1126_v47 = vpop.eup %1125 }
 0x18c   : > { %v1128_v48 = vpop.eup %1127  ;;  %959 = vmatprep.mubr.f32.mxu1 %v1126_v47 }
 0x18d   : > { %960 = vmatmul.mubr.f32.gmra.mrb[14].mxu1 %v1128_v48 }
 0x244   : > { %v940_v50 = vpop.f32.mrb[0].mxu1 }
 0x245   : > { %v569_v51 = vadd.f32 %v940_v50, %v778_v49  ;;  %v563_v52 = vpop.f32.mrb[1].mxu1 }
 0x246   : > { %v564_v53 = vadd.f32 %v778_v49, %v563_v52 }
 0x247   : > { %643 = vst [vmem:[%s1556_s10 + $0x8] sm:$0xff] %v569_v51 }
 0x248   : > { %642 = vst [vmem:[%s1556_s10] sm:$0xff] %v564_v53  ;;  %v943_v54 = vpop.f32.mrb[2].mxu1 }
 0x249   : > { %v579_v55 = vadd.f32 %v943_v54, %v778_v49  ;;  %v573_v56 = vpop.f32.mrb[3].mxu1 }
 0x24a   : > { %v574_v57 = vadd.f32 %v778_v49, %v573_v56 }
 0x24b   : > { %645 = vst [vmem:[%s1556_s10 + $0x18] sm:$0xff] %v579_v55 }
 0x24c   : > { %644 = vst [vmem:[%s1556_s10 + $0x10] sm:$0xff] %v574_v57  ;;  %v946_v58 = vpop.f32.mrb[4].mxu1 }
 0x24d   : > { %v589_v59 = vadd.f32 %v946_v58, %v778_v49  ;;  %v583_v60 = vpop.f32.mrb[5].mxu1 }
 0x24e   : > { %v584_v61 = vadd.f32 %v778_v49, %v583_v60 }
 0x24f   : > { %647 = vst [vmem:[%s1556_s10 + $0x28] sm:$0xff] %v589_v59 }
 0x250   : > { %646 = vst [vmem:[%s1556_s10 + $0x20] sm:$0xff] %v584_v61  ;;  %v949_v62 = vpop.f32.mrb[6].mxu1 }
 0x251   : > { %v599_v63 = vadd.f32 %v949_v62, %v778_v49  ;;  %v593_v0 = vpop.f32.mrb[7].mxu1 }
 0x252   : > { %v594_v1 = vadd.f32 %v778_v49, %v593_v0 }
 0x253   : > { %649 = vst [vmem:[%s1556_s10 + $0x38] sm:$0xff] %v599_v63 }
 0x254   : > { %648 = vst [vmem:[%s1556_s10 + $0x30] sm:$0xff] %v594_v1  ;;  %v952_v2 = vpop.f32.mrb[8].mxu1 }
 0x255   : > { %v609_v3 = vadd.f32 %v952_v2, %v778_v49  ;;  %v603_v4 = vpop.f32.mrb[9].mxu1 }
 0x256   : > { %v604_v5 = vadd.f32 %v778_v49, %v603_v4 }
 0x257   : > { %651 = vst [vmem:[%s1556_s10 + $0x48] sm:$0xff] %v609_v3 }
 0x258   : > { %650 = vst [vmem:[%s1556_s10 + $0x40] sm:$0xff] %v604_v5  ;;  %v955_v6 = vpop.f32.mrb[10].mxu1 }
 0x259   : > { %v619_v7 = vadd.f32 %v955_v6, %v778_v49  ;;  %v613_v8 = vpop.f32.mrb[11].mxu1 }
 0x25a   : > { %v614_v9 = vadd.f32 %v778_v49, %v613_v8 }
 0x25b   : > { %653 = vst [vmem:[%s1556_s10 + $0x58] sm:$0xff] %v619_v7 }
 0x25c   : > { %652 = vst [vmem:[%s1556_s10 + $0x50] sm:$0xff] %v614_v9  ;;  %v958_v10 = vpop.f32.mrb[12].mxu1 }
 0x25d   : > { %v629_v11 = vadd.f32 %v958_v10, %v778_v49  ;;  %v623_v12 = vpop.f32.mrb[13].mxu1 }
 0x25e   : > { %v624_v13 = vadd.f32 %v778_v49, %v623_v12 }
 0x25f   : > { %655 = vst [vmem:[%s1556_s10 + $0x68] sm:$0xff] %v629_v11 }
 0x260   : > { %654 = vst [vmem:[%s1556_s10 + $0x60] sm:$0xff] %v624_v13  ;;  %v961_v14 = vpop.f32.mrb[14].mxu1 }
 0x261   : > { %v639_v15 = vadd.f32 %v961_v14, %v778_v49  ;;  %v633_v16 = vpop.f32.mrb[15].mxu1 }
 0x262   : > { %v634_v17 = vadd.f32 %v778_v49, %v633_v16 }
 0x263   : > { %657 = vst [vmem:[%s1556_s10 + $0x78] sm:$0xff] %v639_v15 }
 0x264   : > { %656 = vst [vmem:[%s1556_s10 + $0x70] sm:$0xff] %v634_v17 }
 0x265   : > { %1228 = shalt.err (!%p1225_p7)
}
 0x266   : > { %s1229_s12 = scalar_lea.hbm %s1577_s11, 2048  ;;  %s1233_s15 = scalar_lea.hbm %s1629_s5, 8192 }
 0x267   : > { %p1230_p9 = scmp.ne.s32.totalorder %s1577_s11, %s1229_s12  ;;  %p1234_p5 = scmp.lt.u32.totalorder %s1577_s11, %s1629_s5 }
 0x268   : > { %p1235_p10 = scmp.lt.u32.totalorder %s1233_s15, %s1229_s12  ;;  %p1237_p2 = scmp.lt.u32.totalorder %s1229_s12, %s1577_s11 }
 0x269   : > { %p1231_p12 = pnand %p1230_p9, %p1443_p6 }
 0x26a   : > { %p1236_p1 = por %p1235_p10, %p1234_p5 }
 0x26b   : > { %p1232_p0 = pneg %p1231_p12 }
 0x26c   : > { %p1238_p4 = por %p1237_p2, %p1236_p1 }
 0x26e   : > { %p1239_p8 = pnand %p1238_p4, %p1232_p0 }
 0x270   : > { %1242 = shalt.err (!%p1239_p8)
}
 0x271   : > { %s1293_s28 = smov 128   ;;  %s1294_s9 = smov 8  }
 0x272   : > { %1036 = dma.vmem_to_hbm [thread:$0]  (%p1443_p6), %s1579_s13, 2048, %s1577_s11, %s659_s22, %s1293_s28, %s1293_s28, %s1294_s9  }
 0x273 PF: > { %p1058_p11 = scmp.ge.s32.totalorder %s1285_s21, 2  ;;  %s687_s30 = sand.u32 1, %s1273_s18  }
 0x274   : > { %p1644_p13 = scmp.ne.s32.totalorder %s1634_s25, 0  ;;  %s688_s17 = scalar_lea.sflag [#allocation4], %s687_s30 }
 0x276   : > { %p1050_p3 = pnand %p1058_p11, %p1644_p13 }
 0x278   : > { %1268 = dma.done.wait (!%p1050_p3), %s688_s17, 2048  }
 0x279   : > { %1270 = vsyncadd (!%p1050_p3), %s688_s17, 4294965248  ;;  %p19_p7 = scmp.ge.s32.totalorder %s1433_s29, 6   ;;  %s1645_s18 = smov %s1277_s19 }
 0x27a   : > { %s1646_s19 = smov %s1281_s20  ;;  %s1647_s20 = smov %s1449_s27 }
 0x27b   : > { %s1648_s21 = smov %s1433_s29  ;;  %21 = sbr.rel (!%p19_p7) target bundleno = 6 (0x6), region = 93 }
 0x282   :  { %693 = vsyncpa [#allocation3], 1 }
 0x283   :  { %695 = vsyncpa [#allocation3 + $0x1], 1 }
 0x284   :  { %696 = vsyncpa [#allocation6], 1 }
 0x285   :  { %697 = vsyncpa [#allocation4], 1 }
 0x286   :  { %699 = vsyncpa [#allocation4 + $0x1], 1 }

</bundles_post_ra>
